<compile_context>
chip_gen: v7x
topology: tpu7x:2x2x1
jax: 0.10.0
libtpu: 0.0.40
codegen_flags: <defaults>
</compile_context>

<pallas_src>
import math
import jax
import jax.numpy as jnp
from jax.experimental import pallas as pl
from jax.experimental.pallas import tpu as pltpu

NUMNODES = 50
DIMSTATES = 2 * NUMNODES + 1      # 101
HIDDEN = NUMNODES + 2             # 52
NOUT = 3


def policy_kernel(xt_ref, w1_ref, w2_ref, w3_ref, b1_ref, b2_ref, b3_ref, o_ref):
    xt = xt_ref[...]                                                   # bf16 (DIMSTATES, tb)
    h1 = jnp.dot(w1_ref[...], xt, preferred_element_type=jnp.float32) + b1_ref[...]
    h1 = jnp.maximum(h1, 0.0).astype(jnp.bfloat16)                     # (HIDDEN, tb)
    h2 = jnp.dot(w2_ref[...], h1, preferred_element_type=jnp.float32) + b2_ref[...]
    h2 = jnp.maximum(h2, 0.0).astype(jnp.bfloat16)                     # (HIDDEN, tb)
    logits = jnp.dot(w3_ref[...], h2, preferred_element_type=jnp.float32) + b3_ref[...]
    # Softmax along the NOUT (sublane) axis == PyTorch softmax(dim=0) per state.
    m = jnp.max(logits, axis=0, keepdims=True)
    e = jnp.exp(logits - m)
    s = jnp.sum(e, axis=0, keepdims=True)
    o_ref[...] = e / s                                                 # exact: rows sum to 1


def _ceil_div(a, b):
    return -(-a // b)


def _round_up(a, b):
    return _ceil_div(a, b) * b


def policy_forward(x, params, *, block_b=512):
    """x: (DIMSTATES,) or (B, DIMSTATES) float -> (NOUT,) or (B, NOUT) probabilities."""
    w1, b1, w2, b2, w3, b3 = params            # PyTorch layout: w (out, in), b (out,)
    squeeze = (x.ndim == 1)
    xb = x[None, :] if squeeze else x
    B = xb.shape[0]

    # Batch tile = lane axis of the transposed problem. Small B -> single full block
    # (no padding, block dims == array dims). Larger B -> 128-lane-aligned tiles with
    # >= 2 grid steps so v7x can use both TensorCores; last block may be partial.
    tb_cap = max(128, _round_up(int(block_b), 128))
    if B <= 128:
        tb = B
    else:
        n_steps = max(2, _ceil_div(B, tb_cap))
        tb = _round_up(_ceil_div(B, n_steps), 128)
    grid = _ceil_div(B, tb)

    # One fused pass over x: bf16 cast + transpose -> (DIMSTATES, B), batch on lanes.
    xt = xb.astype(jnp.bfloat16).T
    w1b = w1.astype(jnp.bfloat16)
    w2b = w2.astype(jnp.bfloat16)
    w3b = w3.astype(jnp.bfloat16)
    b1c = b1.astype(jnp.float32).reshape(HIDDEN, 1)
    b2c = b2.astype(jnp.float32).reshape(HIDDEN, 1)
    b3c = b3.astype(jnp.float32).reshape(NOUT, 1)

    const = lambda shape: pl.BlockSpec(shape, lambda i: (0, 0))        # VMEM-resident operands
    flops = 2 * B * (DIMSTATES * HIDDEN + HIDDEN * HIDDEN + HIDDEN * NOUT)
    bytes_accessed = B * DIMSTATES * 2 + B * NOUT * 4                  # bf16 x read + f32 probs write

    out_t = pl.pallas_call(
        policy_kernel,
        out_shape=jax.ShapeDtypeStruct((NOUT, B), jnp.float32),
        grid=(grid,),
        in_specs=[
            pl.BlockSpec((DIMSTATES, tb), lambda i: (0, i)),           # x^T: tiled over batch lanes
            const((HIDDEN, DIMSTATES)),                                # W1 (fetched once;
            const((HIDDEN, HIDDEN)),                                   # W2  constant index_maps)
            const((NOUT, HIDDEN)),                                     # W3
            const((HIDDEN, 1)),                                        # b1
            const((HIDDEN, 1)),                                        # b2
            const((NOUT, 1)),                                          # b3
        ],
        out_specs=pl.BlockSpec((NOUT, tb), lambda i: (0, i)),          # lane-dense (3, tb) store
        compiler_params=pltpu.CompilerParams(
            dimension_semantics=("parallel",)),                        # batch axis -> both TCs on v7x
        cost_estimate=pl.CostEstimate(
            flops=flops, transcendentals=B * NOUT, bytes_accessed=bytes_accessed),
    )(xt, w1b, w2b, w3b, b1c, b2c, b3c)

    out = out_t.T                                                      # (B, NOUT)
    return out[0] if squeeze else out


def init_params(key):
    """PyTorch-style init: U(-1/sqrt(fan_in), 1/sqrt(fan_in)).
    Weights stored in nn.Linear layout (out_features, in_features); biases 1-D."""
    ks = jax.random.split(key, 6)

    def lin(kw, kb, fan_in, fan_out):
        bound = 1.0 / math.sqrt(fan_in)
        w = jax.random.uniform(kw, (fan_out, fan_in), jnp.float32, -bound, bound)
        b = jax.random.uniform(kb, (fan_out,), jnp.float32, -bound, bound)
        return w, b

    w1, b1 = lin(ks[0], ks[1], DIMSTATES, HIDDEN)
    w2, b2 = lin(ks[2], ks[3], HIDDEN, HIDDEN)
    w3, b3 = lin(ks[4], ks[5], HIDDEN, NOUT)
    return (w1, b1, w2, b2, w3, b3)


def reference_forward(x, params):
    w1, b1, w2, b2, w3, b3 = params
    h1 = jnp.maximum(x @ w1.T + b1, 0.0)
    h2 = jnp.maximum(h1 @ w2.T + b2, 0.0)
    logits = h2 @ w3.T + b3
    return jax.nn.softmax(logits, axis=-1)


if __name__ == "__main__":
    key = jax.random.PRNGKey(0)
    kp, kx1, kx2 = jax.random.split(key, 3)
    params = init_params(kp)

    # Small batch: single full block, weights VMEM-resident, no padding.
    B = 16
    xb = jax.random.normal(kx1, (B, DIMSTATES), jnp.float32)
    probs_b = policy_forward(xb, params)
    jax.block_until_ready(probs_b)
    ref_b = reference_forward(xb, params)
    assert probs_b.shape == (B, NOUT)
    # bf16 matmul inputs (f32 accumulation) -> compare against f32 ref at ~1e-2 tolerance.
    assert jnp.allclose(probs_b, ref_b, atol=2e-2, rtol=2e-2), float(jnp.abs(probs_b - ref_b).max())
    # Exact divide in the kernel -> rows sum to 1 at f32 precision.
    assert jnp.allclose(jnp.sum(probs_b, axis=-1), 1.0, atol=1e-4)

    # Single-state path (matches PyTorch Policy.forward on a 1-D state, softmax dim=0).
    x1 = jax.random.normal(kx2, (DIMSTATES,), jnp.float32)
    probs_1 = policy_forward(x1, params)
    jax.block_until_ready(probs_1)
    ref_1 = reference_forward(x1, params)
    assert probs_1.shape == (NOUT,)
    assert jnp.allclose(probs_1, ref_1, atol=2e-2, rtol=2e-2)
    assert jnp.allclose(jnp.sum(probs_1), 1.0, atol=1e-4)

    # Batch that exercises the multi-step grid + ragged (partial last block) path.
    B2 = 300
    xb2 = jax.random.normal(kx2, (B2, DIMSTATES), jnp.float32)
    probs_b2 = policy_forward(xb2, params)
    jax.block_until_ready(probs_b2)
    ref_b2 = reference_forward(xb2, params)
    assert probs_b2.shape == (B2, NOUT)
    assert jnp.allclose(probs_b2, ref_b2, atol=2e-2, rtol=2e-2), float(jnp.abs(probs_b2 - ref_b2).max())
    assert jnp.allclose(jnp.sum(probs_b2, axis=-1), 1.0, atol=1e-4)

    print("KERNEL_OK")
</pallas_src>

<mosaic_0001>
module attributes {stable_mosaic.version = 11 : i64} {
  func.func @policy_kernel(%arg0: i32, %arg1: memref<101x16xbf16, #tpu.memory_space<vmem>>, %arg2: memref<52x101xbf16, #tpu.memory_space<vmem>>, %arg3: memref<52x52xbf16, #tpu.memory_space<vmem>>, %arg4: memref<3x52xbf16, #tpu.memory_space<vmem>>, %arg5: memref<52x1xf32, #tpu.memory_space<vmem>>, %arg6: memref<52x1xf32, #tpu.memory_space<vmem>>, %arg7: memref<3x1xf32, #tpu.memory_space<vmem>>, %arg8: memref<3x16xf32, #tpu.memory_space<vmem>>) attributes {dimension_semantics = [#tpu.dimension_semantics<parallel>], iteration_bounds = array<i64: 1>, scalar_prefetch = 0 : i64, scratch_operands = 0 : i64, tpu.core_type = #tpu.core_type<tc>, window_params = [{transform_indices = @transform_0, window_bounds = array<i64: 101, 16>}, {pipeline_mode = #tpu.pipeline_mode<synchronous>, transform_indices = @transform_1, window_bounds = array<i64: 52, 101>}, {pipeline_mode = #tpu.pipeline_mode<synchronous>, transform_indices = @transform_2, window_bounds = array<i64: 52, 52>}, {pipeline_mode = #tpu.pipeline_mode<synchronous>, transform_indices = @transform_3, window_bounds = array<i64: 3, 52>}, {pipeline_mode = #tpu.pipeline_mode<synchronous>, transform_indices = @transform_4, window_bounds = array<i64: 52, 1>}, {pipeline_mode = #tpu.pipeline_mode<synchronous>, transform_indices = @transform_5, window_bounds = array<i64: 52, 1>}, {pipeline_mode = #tpu.pipeline_mode<synchronous>, transform_indices = @transform_6, window_bounds = array<i64: 3, 1>}, {transform_indices = @transform_7, window_bounds = array<i64: 3, 16>}]} {
    %c0 = arith.constant 0 : index
    %c0_0 = arith.constant 0 : index
    %0 = vector.load %arg1[%c0, %c0_0] : memref<101x16xbf16, #tpu.memory_space<vmem>>, vector<101x16xbf16>
    %c0_1 = arith.constant 0 : index
    %c0_2 = arith.constant 0 : index
    %1 = vector.load %arg2[%c0_1, %c0_2] : memref<52x101xbf16, #tpu.memory_space<vmem>>, vector<52x101xbf16>
    %cst = arith.constant dense<0.000000e+00> : vector<52x16xf32>
    %2 = tpu.matmul %1, %0, %cst {dimension_numbers = #tpu.dot_dimension_numbers<[1], [0], [0], [1], [0, 0, 1, 1], [], []>} : vector<52x101xbf16>, vector<101x16xbf16>, vector<52x16xf32> -> vector<52x16xf32>
    %c0_3 = arith.constant 0 : index
    %c0_4 = arith.constant 0 : index
    %3 = vector.load %arg5[%c0_3, %c0_4] : memref<52x1xf32, #tpu.memory_space<vmem>>, vector<52x1xf32>
    %4 = vector.broadcast %3 : vector<52x1xf32> to vector<52x16xf32>
    %5 = arith.addf %2, %4 : vector<52x16xf32>
    %cst_5 = arith.constant 0.000000e+00 : f32
    %6 = vector.broadcast %cst_5 : f32 to vector<52x16xf32>
    %7 = arith.maximumf %5, %6 : vector<52x16xf32>
    %8 = arith.truncf %7 : vector<52x16xf32> to vector<52x16xbf16>
    %c0_6 = arith.constant 0 : index
    %c0_7 = arith.constant 0 : index
    %9 = vector.load %arg3[%c0_6, %c0_7] : memref<52x52xbf16, #tpu.memory_space<vmem>>, vector<52x52xbf16>
    %cst_8 = arith.constant dense<0.000000e+00> : vector<52x16xf32>
    %10 = tpu.matmul %9, %8, %cst_8 {dimension_numbers = #tpu.dot_dimension_numbers<[1], [0], [0], [1], [0, 0, 1, 1], [], []>} : vector<52x52xbf16>, vector<52x16xbf16>, vector<52x16xf32> -> vector<52x16xf32>
    %c0_9 = arith.constant 0 : index
    %c0_10 = arith.constant 0 : index
    %11 = vector.load %arg6[%c0_9, %c0_10] : memref<52x1xf32, #tpu.memory_space<vmem>>, vector<52x1xf32>
    %12 = vector.broadcast %11 : vector<52x1xf32> to vector<52x16xf32>
    %13 = arith.addf %10, %12 : vector<52x16xf32>
    %cst_11 = arith.constant 0.000000e+00 : f32
    %14 = vector.broadcast %cst_11 : f32 to vector<52x16xf32>
    %15 = arith.maximumf %13, %14 : vector<52x16xf32>
    %16 = arith.truncf %15 : vector<52x16xf32> to vector<52x16xbf16>
    %c0_12 = arith.constant 0 : index
    %c0_13 = arith.constant 0 : index
    %17 = vector.load %arg4[%c0_12, %c0_13] : memref<3x52xbf16, #tpu.memory_space<vmem>>, vector<3x52xbf16>
    %cst_14 = arith.constant dense<0.000000e+00> : vector<3x16xf32>
    %18 = tpu.matmul %17, %16, %cst_14 {dimension_numbers = #tpu.dot_dimension_numbers<[1], [0], [0], [1], [0, 0, 1, 1], [], []>} : vector<3x52xbf16>, vector<52x16xbf16>, vector<3x16xf32> -> vector<3x16xf32>
    %c0_15 = arith.constant 0 : index
    %c0_16 = arith.constant 0 : index
    %19 = vector.load %arg7[%c0_15, %c0_16] : memref<3x1xf32, #tpu.memory_space<vmem>>, vector<3x1xf32>
    %20 = vector.broadcast %19 : vector<3x1xf32> to vector<3x16xf32>
    %21 = arith.addf %18, %20 : vector<3x16xf32>
    %cst_17 = arith.constant dense<0xFF800000> : vector<16xf32>
    %22 = vector.multi_reduction <maximumf>, %21, %cst_17 [0] : vector<3x16xf32> to vector<16xf32>
    %23 = vector.shape_cast %22 : vector<16xf32> to vector<1x16xf32>
    %24 = vector.broadcast %23 : vector<1x16xf32> to vector<3x16xf32>
    %25 = arith.subf %21, %24 : vector<3x16xf32>
    %26 = math.exp %25 : vector<3x16xf32>
    %cst_18 = arith.constant dense<0.000000e+00> : vector<16xf32>
    %27 = vector.multi_reduction <add>, %26, %cst_18 [0] : vector<3x16xf32> to vector<16xf32>
    %28 = vector.shape_cast %27 : vector<16xf32> to vector<1x16xf32>
    %29 = vector.broadcast %28 : vector<1x16xf32> to vector<3x16xf32>
    %30 = arith.divf %26, %29 : vector<3x16xf32>
    %c0_19 = arith.constant 0 : index
    %c0_20 = arith.constant 0 : index
    %31 = vector.load %arg8[%c0_19, %c0_20] : memref<3x16xf32, #tpu.memory_space<vmem>>, vector<3x16xf32>
    tpu.vector_store %arg8[%c0_19, %c0_20], %30 {strides = array<i32>} : memref<3x16xf32, #tpu.memory_space<vmem>>, vector<3x16xf32>,
    return
  }
  func.func @transform_0(%arg0: i32) -> (i32, i32) {
    %c0_i32 = arith.constant 0 : i32
    %c0_i32_0 = arith.constant 0 : i32
    return %c0_i32, %arg0 : i32, i32
  }
  func.func @transform_1(%arg0: i32) -> (i32, i32) {
    %c0_i32 = arith.constant 0 : i32
    %c0_i32_0 = arith.constant 0 : i32
    %c0_i32_1 = arith.constant 0 : i32
    return %c0_i32, %c0_i32_0 : i32, i32
  }
  func.func @transform_2(%arg0: i32) -> (i32, i32) {
    %c0_i32 = arith.constant 0 : i32
    %c0_i32_0 = arith.constant 0 : i32
    %c0_i32_1 = arith.constant 0 : i32
    return %c0_i32, %c0_i32_0 : i32, i32
  }
  func.func @transform_3(%arg0: i32) -> (i32, i32) {
    %c0_i32 = arith.constant 0 : i32
    %c0_i32_0 = arith.constant 0 : i32
    %c0_i32_1 = arith.constant 0 : i32
    return %c0_i32, %c0_i32_0 : i32, i32
  }
  func.func @transform_4(%arg0: i32) -> (i32, i32) {
    %c0_i32 = arith.constant 0 : i32
    %c0_i32_0 = arith.constant 0 : i32
    %c0_i32_1 = arith.constant 0 : i32
    return %c0_i32, %c0_i32_0 : i32, i32
  }
  func.func @transform_5(%arg0: i32) -> (i32, i32) {
    %c0_i32 = arith.constant 0 : i32
    %c0_i32_0 = arith.constant 0 : i32
    %c0_i32_1 = arith.constant 0 : i32
    return %c0_i32, %c0_i32_0 : i32, i32
  }
  func.func @transform_6(%arg0: i32) -> (i32, i32) {
    %c0_i32 = arith.constant 0 : i32
    %c0_i32_0 = arith.constant 0 : i32
    %c0_i32_1 = arith.constant 0 : i32
    return %c0_i32, %c0_i32_0 : i32, i32
  }
  func.func @transform_7(%arg0: i32) -> (i32, i32) {
    %c0_i32 = arith.constant 0 : i32
    %c0_i32_0 = arith.constant 0 : i32
    return %c0_i32, %arg0 : i32, i32
  }
}

</mosaic_0001>

<bundles_post_ra>
// kernel: tpu_custom_call.1
= control target key start
LH: loop header
LB: loop body
LE: loop exit
PB: predicated region body
PF: predicated region fallthrough
CT: control target
= control target key end

     0   :  { %vm147_vm0 = vcmask 826368   ;;  %vm160_vm1 = vcmask 1041408   ;;  %v637_v5 = vmov 0   ;;  %vm161_vm2 = vcmask 1042432   ;;  %s803_s0 = inlined_call_operand.vmem [shape: bf16[101,16], index: 0, kind: input, shape index: {}]   ;;  %s804_s1 = inlined_call_operand.vmem [shape: bf16[52,101], index: 1, kind: input, shape index: {}]   ;;  %s805_s2 = inlined_call_operand.vmem [shape: bf16[52,52], index: 2, kind: input, shape index: {}]   ;;  %s806_s3 = inlined_call_operand.vmem [shape: bf16[3,52], index: 3, kind: input, shape index: {}]   ;;  %s807_s4 = inlined_call_operand.vmem [shape: f32[52,1], index: 4, kind: input, shape index: {}]   ;;  %s808_s5 = inlined_call_operand.vmem [shape: f32[52,1], index: 5, kind: input, shape index: {}]   ;;  %s809_s6 = inlined_call_operand.vmem [shape: f32[3,1], index: 6, kind: input, shape index: {}]   ;;  %s810_s7 = inlined_call_operand.hbm [shape: f32[3,16], index: 7, kind: output, shape index: {}]  }
   0x1   :  { %v594_v0 = vld [vmem:[%s803_s0] sm:$0xff]   ;;  %v595_v1 = vld [vmem:[%s803_s0 + $0x8] sm:$0xff]   ;;  %v596_v2 = vld [vmem:[%s803_s0 + $0x10] sm:$0xff]   ;;  %592 = vset.pattern.permute.xlu0 %v637_v5  ;;  %593 = vset.pattern.permute.xlu1 %v637_v5  ;;  %v638_v9 = vmov 65535  }
   0x2   :  { %536 = vmatprep.subr.bf16.mxu0 %v594_v0  ;;  %v601_v3 = vld [vmem:[%s804_s1] sm:$0xff]   ;;  %v597_v4 = vld [vmem:[%s803_s0 + $0x18] sm:$0xff]   ;;  %v50_v7 = vld [vmem:[%s807_s4 + $0x10] sm:$0xff]  ;;  %v162_v10 = vsel %vm160_vm1, 4294967295, %v638_v9 }
   0x3   :  { %537 = vmatpush3.bf16.msra.mxu0 %v594_v0  ;;  %550 = vmatprep.mubr.msk.bf16.mxu0 %vm147_vm0, %v601_v3  ;;  %v48_v6 = vld [vmem:[%s807_s4] sm:$0xff]  ;;  %v49_v11 = vld [vmem:[%s807_s4 + $0x8] sm:$0xff]  ;;  %v51_v12 = vld [vmem:[%s807_s4 + $0x18] sm:$0xff]  ;;  %v163_v16 = vsel %vm161_vm2, %v162_v10, 0 }
   0x4   :  { %538 = vmatprep.subr.bf16.mxu0 %v595_v1  ;;  %57 = vperm.xlu0 %592, %v48_v6   ;;  %v598_v8 = vld [vmem:[%s803_s0 + $0x20] sm:$0xff]   ;;  %v599_v13 = vld [vmem:[%s803_s0 + $0x28] sm:$0xff]   ;;  %v600_v14 = vld [vmem:[%s803_s0 + $0x30] ss:$0 sps:$4 sm:$0x77]  }
   0x5   :  { %67 = vperm.xlu1 %593, %v50_v7   ;;  %v52_v15 = vld [vmem:[%s807_s4 + $0x20] sm:$0xff]  ;;  %v53_v17 = vld [vmem:[%s807_s4 + $0x28] sm:$0xff] }
   0x7   :  { %539 = vmatpush3.bf16.msra.mxu0 %v595_v1 }
   0x8   :  { %540 = vmatprep.subr.bf16.mxu0 %v596_v2  ;;  %62 = vperm.xlu0 %592, %v49_v11  }
   0x9   :  { %72 = vperm.xlu1 %593, %v51_v12  }
   0xb   :  { %541 = vmatpush3.bf16.msra.mxu0 %v596_v2 }
   0xc   :  { %542 = vmatprep.subr.bf16.mxu0 %v597_v4 }
   0xf   :  { %543 = vmatpush3.bf16.msra.mxu0 %v597_v4 }
  0x10   :  { %544 = vmatprep.subr.bf16.mxu0 %v598_v8 }
  0x11   :  { %12 = vsyncpa [#allocation3], 0  ;;  %77 = vperm.xlu0 %592, %v52_v15   ;;  %v165_v18 = vand.u32 %v600_v14, %v163_v16  ;;  %v54_v19 = vld [vmem:[%s807_s4 + $0x30] sm:$0xf]  ;;  %82 = vperm.xlu1 %593, %v53_v17   ;;  %v249_v20 = vld [vmem:[%s808_s5] sm:$0xff]  ;;  %vm309_vm3 = vcmask 424960  }
  0x12   :  { %v250_v21 = vld [vmem:[%s808_s5 + $0x8] sm:$0xff]  ;;  %v251_v22 = vld [vmem:[%s808_s5 + $0x10] sm:$0xff]  ;;  %v252_v25 = vld [vmem:[%s808_s5 + $0x18] sm:$0xff]  ;;  %v639_v5 = vmov 0.0   ;;  %vm640_vm4 = vmmov 0   ;;  %vm453_vm5 = vcmask 124928  }
  0x13   :  { %545 = vmatpush3.bf16.msra.mxu0 %v598_v8  ;;  %v602_v23 = vld [vmem:[%s804_s1 + $0x8] sm:$0xff]   ;;  %v603_v24 = vld [vmem:[%s804_s1 + $0x10] sm:$0xff]   ;;  %v253_v26 = vld [vmem:[%s808_s5 + $0x20] sm:$0xff] }
  0x14   :  { %546 = vmatprep.subr.bf16.mxu0 %v599_v13  ;;  %v254_v27 = vld [vmem:[%s808_s5 + $0x28] sm:$0xff]  ;;  %v255_v28 = vld [vmem:[%s808_s5 + $0x30] sm:$0xf]  ;;  %v604_v29 = vld [vmem:[%s804_s1 + $0x18] ss:$0 sps:$4 sm:$0x33]  }
  0x15   :  { %87 = vperm.xlu0 %592, %v54_v19   ;;  %258 = vperm.xlu1 %593, %v249_v20   ;;  %v401_v30 = vld [vmem:[%s809_s6] sm:$0x7]  ;;  %v606_v2 = vld [vmem:[%s805_s2 + $0x8] sm:$0xff]   ;;  %v607_v3 = vld [vmem:[%s805_s2 + $0x10] sm:$0xff]  }
  0x16   :  { %v605_v31 = vld [vmem:[%s805_s2] sm:$0xff]   ;;  %v608_v4 = vld [vmem:[%s805_s2 + $0x18] ss:$0 sps:$4 sm:$0x33]  }
  0x17   :  { %547 = vmatpush3.bf16.msra.mxu0 %v599_v13  ;;  %566 = vmatprep.mubr.msk.bf16.mxu1 %vm309_vm3, %v605_v31 }
  0x18   :  { %548 = vmatprep.subr.bf16.mxu0 %v165_v18 }
  0x19   :  { %263 = vperm.xlu0 %592, %v250_v21   ;;  %268 = vperm.xlu1 %593, %v251_v22  }
  0x1b   :  { %549 = vmatpush3.bf16.msra.mxu0 %v165_v18 }
  0x1d   :  { %273 = vperm.xlu0 %592, %v252_v25   ;;  %278 = vperm.xlu1 %593, %v253_v26  }
  0x1e   :  { %551 = vmatmul.mubr.msk.bf16.vlgmr.msra.gmra.mrb[0].mxu0 %vm147_vm0, %v602_v23 }
  0x1f   :  { %554 = vmatprep.mubr.msk.bf16.mxu0 %vm147_vm0, %v603_v24 }
  0x21   :  { %283 = vperm.xlu0 %592, %v254_v27   ;;  %288 = vperm.xlu1 %593, %v255_v28  }
  0x25   :  { %404 = vperm.xlu0 %592, %v401_v30  }
  0x26   :  { %555 = vmatmul.mubr.msk.bf16.gmra.mrb[4].mxu0 %vm147_vm0, %v604_v29 }
  0x83   :  { %v58_v32 = vpop.permute.xlu0 %57 }
  0x84   :  { %v68_v33 = vpop.permute.xlu1 %67 }
  0x87   :  { %v63_v34 = vpop.permute.xlu0 %62 }
  0x88   :  { %v73_v38 = vpop.permute.xlu1 %72 }
  0x90   :  { %v78_v41 = vpop.permute.xlu0 %77  ;;  %v83_v57 = vpop.permute.xlu1 %82 }
  0x94   :  { %v88_v52 = vpop.permute.xlu0 %87  ;;  %v259_v6 = vpop.permute.xlu1 %258 }
  0x98   :  { %v264_v7 = vpop.permute.xlu0 %263  ;;  %v269_v8 = vpop.permute.xlu1 %268 }
  0x9c   :  { %v274_v10 = vpop.permute.xlu0 %273  ;;  %v279_v13 = vpop.permute.xlu1 %278 }
  0xa0   :  { %v289_v24 = vpop.permute.xlu1 %288  ;;  %v284_v31 = vpop.permute.xlu0 %283 }
  0xf1   :  { %v552_v35 = vpop.f32.mrb[0].mxu0 }
  0xf2   :  { %v210_v36 = vadd.f32 %v552_v35, %v68_v33  ;;  %v201_v37 = vpop.f32.mrb[1].mxu0 }
  0xf3   :  { %v202_v39 = vadd.f32 %v201_v37, %v58_v32  ;;  %v553_v40 = vpop.f32.mrb[2].mxu0 }
  0xf4   :  { %v213_v42 = vadd.f32 %v553_v40, %v73_v38  ;;  %v204_v43 = vpop.f32.mrb[3].mxu0  ;;  %v233_v45 = vmax.f32 %v210_v36, 0.0  ;;  %v400_v40 = vld [vmem:[%s806_s3] sm:$0x3]  ;;  %s641_s3 = smov [#allocation2]  }
  0xf5   :  { %v205_v44 = vadd.f32 %v204_v43, %v63_v34  ;;  %v231_v47 = vmax.f32 %v202_v39, 0.0  ;;  %s480_s10 = sshll.u32 %s641_s3, 4  ;;  %s481_s10 = int_to_ptr.vmem [resolvable:$true] %s480_s10 }
  0xf6   :  { %v234_v46 = vmax.f32 %v213_v42, 0.0  ;;  %s613_s11 = scalar_lea.vmem %s481_s10, 64  ;;  %p618_p1 = scmp.lt.s32.totalorder %s481_s10, %s481_s10 }
  0xf7   :  { %v232_v48 = vmax.f32 %v205_v44, 0.0  ;;  %p614_p0 = scmp.ne.s32.totalorder %s481_s10, %s613_s11  ;;  %p619_p2 = scmp.lt.s32.totalorder %s613_s11, %s613_s11 }
  0xf8   :  { %v239_v49 = vpack.c.bf16 %v234_v46, %v233_v45 }
  0xf9   :  { %v556_v50 = vpop.f32.mrb[4].mxu0  ;;  %v238_v51 = vpack.c.bf16 %v232_v48, %v231_v47  ;;  %p620_p3 = por %p619_p2, %p618_p1 }
  0xfa   :  { %v217_v53 = vpop.f32.mrb[5].mxu0  ;;  %v226_v54 = vadd.f32 %v556_v50, %v88_v52 }
  0xfb   :  { %v218_v55 = vadd.f32 %v217_v53, %v78_v41  ;;  %v557_v56 = vpop.f32.mrb[6].mxu0  ;;  %558 = vmatprep.subr.bf16.mxu1 %v238_v51  ;;  %v405_v41 = vpop.permute.xlu0 %404  ;;  %p621_p4 = pnand %p620_p3, %p614_p0 }
  0xfc   :  { %v220_v58 = vpop.f32.mrb[7].mxu0  ;;  %559 = vmatpush3.bf16.msra.mxu1 %v238_v51  ;;  %v237_v60 = vmax.f32 %v226_v54, 0.0 }
  0xfd   :  { %v221_v59 = vadd.f32 %v220_v58, %v83_v57  ;;  %560 = vmatprep.subr.bf16.mxu1 %v239_v49  ;;  %v235_v61 = vmax.f32 %v218_v55, 0.0 }
  0xfe   :  { %v241_v0 = vpack.c.bf16 %v237_v60, %v237_v60 }
  0xff   :  { %v236_v62 = vmax.f32 %v221_v59, 0.0 }
 0x100   :  { %561 = vmatpush3.bf16.msra.mxu1 %v239_v49  ;;  %v323_v1 = vsel %vm160_vm1, %v241_v0, 0 }
 0x101   :  { %v240_v63 = vpack.c.bf16 %v236_v62, %v235_v61 }
 0x103   :  { %562 = vmatprep.subr.bf16.mxu1 %v240_v63 }
 0x104   :  { %563 = vmatpush3.bf16.msra.mxu1 %v240_v63 }
 0x105   :  { %586 = vmatprep.subr.msk.bf16.mxu1 %vm160_vm1, %v241_v0 }
 0x108   :  { %565 = vmatpush3.bf16.msra.mxu1 %v323_v1 }
 0x109   :  { %574 = vmatprep.subr.bf16.mxu1 %v639_v5 }
 0x10b   :  { %567 = vmatmul.mubr.msk.bf16.vlgmr.msra.gmra.mrb[0].mxu1 %vm309_vm3, %v606_v2 }
 0x10c   :  { %570 = vmatprep.mubr.msk.bf16.mxu1 %vm309_vm3, %v607_v3 }
 0x113   :  { %571 = vmatmul.mubr.msk.bf16.gmra.mrb[4].mxu1 %vm309_vm3, %v608_v4 }
 0x114   :  { %582 = vmatprep.mubr.msk.bf16.mxu1 %vm640_vm4, %v639_v5 }
 0x1de   :  { %v568_v9 = vpop.f32.mrb[0].mxu1 }
 0x1df   :  { %v368_v11 = vadd.f32 %v568_v9, %v269_v8  ;;  %v359_v12 = vpop.f32.mrb[1].mxu1 }
 0x1e0   :  { %v360_v14 = vadd.f32 %v359_v12, %v259_v6  ;;  %v569_v15 = vpop.f32.mrb[2].mxu1 }
 0x1e1   :  { %v371_v16 = vadd.f32 %v569_v15, %v274_v10  ;;  %v362_v17 = vpop.f32.mrb[3].mxu1  ;;  %v391_v19 = vmax.f32 %v368_v11, 0.0 }
 0x1e2   :  { %v363_v18 = vadd.f32 %v362_v17, %v264_v7  ;;  %v389_v21 = vmax.f32 %v360_v14, 0.0 }
 0x1e3   :  { %v392_v20 = vmax.f32 %v371_v16, 0.0 }
 0x1e4   :  { %v390_v22 = vmax.f32 %v363_v18, 0.0 }
 0x1e5   :  { %v397_v23 = vpack.c.bf16 %v392_v20, %v391_v19 }
 0x1e6   :  { %v396_v25 = vpack.c.bf16 %v390_v22, %v389_v21  ;;  %v572_v26 = vpop.f32.mrb[4].mxu1 }
 0x1e7   :  { %v384_v27 = vadd.f32 %v572_v26, %v289_v24  ;;  %v375_v28 = vpop.f32.mrb[5].mxu1 }
 0x1e8   :  { %v376_v29 = vadd.f32 %v375_v28, %v279_v13  ;;  %v573_v30 = vpop.f32.mrb[6].mxu1  ;;  %575 = vmatpush3.bf16.msra.mxu1 %v396_v25 }
 0x1e9   :  { %v378_v32 = vpop.f32.mrb[7].mxu1  ;;  %576 = vmatprep.subr.bf16.mxu1 %v639_v5  ;;  %v395_v34 = vmax.f32 %v384_v27, 0.0 }
 0x1ea   :  { %v379_v33 = vadd.f32 %v378_v32, %v284_v31  ;;  %v393_v35 = vmax.f32 %v376_v29, 0.0 }
 0x1eb   :  { %v399_v38 = vpack.c.bf16 %v395_v34, %v395_v34 }
 0x1ec   :  { %v394_v36 = vmax.f32 %v379_v33, 0.0  ;;  %577 = vmatpush3.bf16.msra.mxu1 %v397_v23 }
 0x1ed   :  { %578 = vmatprep.subr.bf16.mxu1 %v639_v5  ;;  %v411_v39 = vsel %vm160_vm1, %v399_v38, 0 }
 0x1ee   :  { %v398_v37 = vpack.c.bf16 %v394_v36, %v393_v35 }
 0x1f0   :  { %579 = vmatpush3.bf16.msra.mxu1 %v398_v37 }
 0x1f1   :  { %580 = vmatprep.subr.bf16.mxu1 %v639_v5 }
 0x1f4   :  { %581 = vmatpush3.bf16.msra.mxu1 %v411_v39 }
 0x1f7   :  { %583 = vmatmul.mubr.msk.bf16.vlgmr.msra.gmra.mrb[8].mxu1 %vm309_vm3, %v400_v40 }
 0x2ca   :  { %v447_v42 = vpop.f32.mrb[8].mxu1 }
 0x2cb   :  { %v448_v43 = vadd.f32 %v447_v42, %v405_v41  ;;  %v584_v44 = vpop.f32.mrb[9].mxu1 }
 0x2cc   :  { %v450_v45 = vpop.f32.mrb[10].mxu1 }
 0x2cd   :  { %v454_v46 = vsel %vm453_vm5, %v448_v43, -inf  ;;  %v585_v47 = vpop.f32.mrb[11].mxu1 }
 0x2ce   :  { %v455_v48 = vrot.slane %v454_v46, 4 }
 0x2d0   :  { %v456_v49 = vmax.f32 %v454_v46, %v455_v48 }
 0x2d2   :  { %v457_v50 = vrot.slane %v456_v49, 2 }
 0x2d4   :  { %v458_v51 = vmax.f32 %v456_v49, %v457_v50 }
 0x2d6   :  { %v459_v52 = vrot.slane %v458_v51, 1 }
 0x2d8   :  { %v460_v53 = vmax.f32 %v458_v51, %v459_v52 }
 0x2da   :  { %v461_v54 = vsub.f32 %v448_v43, %v460_v53 }
 0x2dc   :  { %v462_v55 = vmul.f32 1.442695, %v461_v54 }
 0x2de   :  { %609 = vpow2.f32 %v462_v55 }
 0x2e8   :  { %v610_v56 = vpop.eup %609 }
 0x2e9   :  { %v464_v57 = vsel %vm453_vm5, %v610_v56, 0.0 }
 0x2ea   :  { %v465_v58 = vrot.slane %v464_v57, 4 }
 0x2ec   :  { %v466_v59 = vadd.f32 %v465_v58, %v464_v57 }
 0x2ee   :  { %v467_v60 = vrot.slane %v466_v59, 2 }
 0x2f0   :  { %v468_v61 = vadd.f32 %v467_v60, %v466_v59 }
 0x2f2   :  { %v469_v62 = vrot.slane %v468_v61, 1 }
 0x2f4   :  { %v470_v63 = vadd.f32 %v469_v62, %v468_v61 }
 0x2f6   :  { %611 = vrcp.f32 %v470_v63 }
 0x300   :  { %v612_v0 = vpop.eup %611 }
 0x301   :  { %v472_v1 = vmul.f32 %v612_v0, %v610_v56 }
 0x303   :  { %473 = vst.msk [vmem:[#allocation2] sm:$0x7] %vm453_vm5, %v472_v1 }
 0x304   :  { %624 = shalt.err (!%p621_p4)
}
 0x305   :  { %s625_s14 = scalar_lea.hbm %s810_s7, 64 }
 0x306   :  { %p626_p5 = scmp.ne.s32.totalorder %s810_s7, %s625_s14  ;;  %p629_p6 = scmp.lt.u32.totalorder %s625_s14, %s810_s7 }
 0x308   :  { %p631_p7 = pnand %p629_p6, %p626_p5 }
 0x30a   :  { %634 = shalt.err (!%p631_p7)
}
 0x30b   :  { %483 = dma.vmem_to_hbm [thread:$0]  %s481_s10, 64, %s810_s7, [#allocation3]  }
 0x30c   :  { %635 = dma.done.wait [#allocation3], 64  }
 0x30d   :  { %636 = vsyncadd [#allocation3], 4294967232 }
 0x30e   :  { %487 = vsyncpa [#allocation3], 1 }

</bundles_post_ra>
